<compile_context>
chip_gen: v7x
topology: tpu7x:2x2x1
jax: 0.10.0
libtpu: 0.0.40
codegen_flags: <defaults>
</compile_context>

<pallas_src>
import functools

import jax
import jax.numpy as jnp
from jax.experimental import pallas as pl
from jax.experimental.pallas import tpu as pltpu


def _basic_block_kernel(x_ref, bk1_ref, s1_ref, b1_ref, bk2_ref, s2_ref,
                        b2_ref, out_ref, *, img_h):
    """Fused conv1+bn1+relu -> conv2+bn2 -> +identity -> relu, one image/step.

    x_ref  : (R, L)     lane-dense activation slab, R = images_per_step * H,
                        L = W*C, lane index = w*C + c.
    bkX_ref: (3, L, L)  width-folded block-tridiagonal conv weights, one
                        (L, L) matrix per vertical tap kh.
    sX/bX  : (1, L)     folded BatchNorm scale / shift, tiled over W.
    out_ref: (R, L)     output slab.
    """
    R, _ = x_ref.shape
    x = x_ref[...]

    # Row index within each image; masks the vertical zero-padding.
    row = jax.lax.broadcasted_iota(jnp.int32, (R, 1), 0)
    h_in = row % img_h
    top = h_in == 0
    bot = h_in == img_h - 1

    def conv3x3(v, bk_ref):
        # kh=0 tap reads the row above, kh=2 reads the row below; both are
        # sublane rotations (XLU) + a select for the image border rows.
        up = jnp.where(top, 0.0, pltpu.roll(v, shift=1, axis=0))       # v[h-1]
        dn = jnp.where(bot, 0.0, pltpu.roll(v, shift=R - 1, axis=0))   # v[h+1]
        acc = jnp.dot(up, bk_ref[0], preferred_element_type=jnp.float32)
        acc = acc + jnp.dot(v, bk_ref[1], preferred_element_type=jnp.float32)
        acc = acc + jnp.dot(dn, bk_ref[2], preferred_element_type=jnp.float32)
        return acc

    # conv1 -> bn1 -> relu            (all lane-dense, (R, L))
    h1 = jnp.maximum(conv3x3(x, bk1_ref) * s1_ref[...] + b1_ref[...], 0.0)
    # conv2 -> bn2
    h2 = conv3x3(h1, bk2_ref) * s2_ref[...] + b2_ref[...]
    # identity shortcut + final relu, lane-dense unmasked store
    out_ref[...] = jnp.maximum(h2 + x, 0.0).astype(out_ref.dtype)


def _fold_width_into_weights(w_hwio, W, C):
    """HWIO (3,3,Cin,Cout) -> (3, W*C, W*C) block-tridiagonal matrices.

    bk[kh][wi*C + cin, w*C + cout] = w_hwio[kh, wi - w + 1, cin, cout] when
    |wi - w| <= 1, else 0.  `slab_row @ bk[kh]` therefore applies all three
    horizontal taps of the conv, including the left/right zero-padding
    behaviour at the image border (the out-of-band blocks simply don't exist).
    """
    shift_eyes = jnp.stack(
        [jnp.eye(W, k=1 - d, dtype=w_hwio.dtype) for d in range(3)])  # (3,W,W)
    bk = jnp.einsum('dvw,kdio->kviwo', shift_eyes, w_hwio)            # (3,W,C,W,C)
    return bk.reshape(3, W * C, W * C)


def basic_block_forward(x_nchw, w1, g1, be1, rm1, rv1, w2, g2, be2, rm2, rv2,
                        eps=1e-5):
    N, C, H, W = x_nchw.shape
    # Only the identity-shortcut path (stride=1, in_planes == planes).
    assert w1.shape == (3, 3, C, C) and w2.shape == (3, 3, C, C), (
        "identity-shortcut path requires in_planes == planes and stride == 1")
    L = W * C  # lane extent of the slab; 128 here (W=16, C=8) -> lane-dense.

    # NCHW -> NHWC -> lane-dense slab (N*H, W*C); the reshape is free/contig.
    x = jnp.transpose(x_nchw, (0, 2, 3, 1)).astype(jnp.float32)
    x2d = x.reshape(N * H, L)

    # Fold BatchNorm (inference) into per-channel scale/shift, tiled over W so
    # the in-kernel broadcasts stay lane-dense.
    inv1 = g1 / jnp.sqrt(rv1 + eps)
    inv2 = g2 / jnp.sqrt(rv2 + eps)
    s1 = jnp.tile(inv1, W).reshape(1, L).astype(jnp.float32)
    b1 = jnp.tile(be1 - rm1 * inv1, W).reshape(1, L).astype(jnp.float32)
    s2 = jnp.tile(inv2, W).reshape(1, L).astype(jnp.float32)
    b2 = jnp.tile(be2 - rm2 * inv2, W).reshape(1, L).astype(jnp.float32)

    bk1 = _fold_width_into_weights(w1.astype(jnp.float32), W, C)
    bk2 = _fold_width_into_weights(w2.astype(jnp.float32), W, C)

    kernel = functools.partial(_basic_block_kernel, img_h=H)
    out2d = pl.pallas_call(
        kernel,
        out_shape=jax.ShapeDtypeStruct((N * H, L), jnp.float32),
        grid=(N,),  # one image per step; >=2 parallel steps feed both v7x TCs
        in_specs=[
            pl.BlockSpec((H, L), lambda n: (n, 0)),
            pl.BlockSpec((3, L, L), lambda n: (0, 0, 0)),  # resident weights
            pl.BlockSpec((1, L), lambda n: (0, 0)),
            pl.BlockSpec((1, L), lambda n: (0, 0)),
            pl.BlockSpec((3, L, L), lambda n: (0, 0, 0)),  # resident weights
            pl.BlockSpec((1, L), lambda n: (0, 0)),
            pl.BlockSpec((1, L), lambda n: (0, 0)),
        ],
        out_specs=pl.BlockSpec((H, L), lambda n: (n, 0)),
        compiler_params=pltpu.CompilerParams(
            dimension_semantics=("parallel",)),
    )(x2d, bk1, s1, b1, bk2, s2, b2)

    # TODO(synk): when chaining blocks in a full ResNet, keep activations in
    # the slab layout between pallas_calls and drop these per-block transposes.
    out_nhwc = out2d.reshape(N, H, W, C)
    return jnp.transpose(out_nhwc, (0, 3, 1, 2))  # back to NCHW


def _reference(x_nchw, w1, g1, be1, rm1, rv1, w2, g2, be2, rm2, rv2, eps=1e-5):
    """Pure-JAX reference (same math as the PyTorch module, eval-mode BN)."""
    x = jnp.transpose(x_nchw, (0, 2, 3, 1))

    def conv(inp, w):
        return jax.lax.conv_general_dilated(
            inp, w, (1, 1), 'SAME',
            dimension_numbers=('NHWC', 'HWIO', 'NHWC'))

    def bn(v, g, b, rm, rv):
        return (v - rm) / jnp.sqrt(rv + eps) * g + b

    h = jax.nn.relu(bn(conv(x, w1), g1, be1, rm1, rv1))
    h = bn(conv(h, w2), g2, be2, rm2, rv2)
    out = jax.nn.relu(h + x)
    return jnp.transpose(out, (0, 3, 1, 2))


if __name__ == "__main__":
    key = jax.random.PRNGKey(0)
    ks = jax.random.split(key, 11)

    N, C, H, W = 2, 8, 16, 16  # in_planes = planes = 8, stride = 1

    x = jax.random.normal(ks[0], (N, C, H, W), jnp.float32)

    # conv weights in HWIO (3, 3, Cin, Cout)
    w1 = 0.1 * jax.random.normal(ks[1], (3, 3, C, C), jnp.float32)
    w2 = 0.1 * jax.random.normal(ks[2], (3, 3, C, C), jnp.float32)

    # BatchNorm parameters / running statistics (deterministic, non-trivial)
    g1 = 1.0 + 0.1 * jax.random.normal(ks[3], (C,), jnp.float32)
    be1 = 0.1 * jax.random.normal(ks[4], (C,), jnp.float32)
    rm1 = 0.1 * jax.random.normal(ks[5], (C,), jnp.float32)
    rv1 = 1.0 + 0.1 * jnp.abs(jax.random.normal(ks[6], (C,), jnp.float32))
    g2 = 1.0 + 0.1 * jax.random.normal(ks[7], (C,), jnp.float32)
    be2 = 0.1 * jax.random.normal(ks[8], (C,), jnp.float32)
    rm2 = 0.1 * jax.random.normal(ks[9], (C,), jnp.float32)
    rv2 = 1.0 + 0.1 * jnp.abs(jax.random.normal(ks[10], (C,), jnp.float32))

    out = basic_block_forward(x, w1, g1, be1, rm1, rv1, w2, g2, be2, rm2, rv2)
    out = jax.block_until_ready(out)

    ref = _reference(x, w1, g1, be1, rm1, rv1, w2, g2, be2, rm2, rv2)
    ref = jax.block_until_ready(ref)

    assert out.shape == (N, C, H, W)
    assert jnp.allclose(out, ref, rtol=1e-3, atol=1e-3), (
        float(jnp.max(jnp.abs(out - ref))))

    print("KERNEL_OK")
</pallas_src>

<mosaic_0001>
module attributes {stable_mosaic.version = 11 : i64} {
  func.func @_basic_block_kernel(%arg0: i32, %arg1: memref<16x128xf32, #tpu.memory_space<vmem>>, %arg2: memref<3x128x128xf32, #tpu.memory_space<vmem>>, %arg3: memref<1x128xf32, #tpu.memory_space<vmem>>, %arg4: memref<1x128xf32, #tpu.memory_space<vmem>>, %arg5: memref<3x128x128xf32, #tpu.memory_space<vmem>>, %arg6: memref<1x128xf32, #tpu.memory_space<vmem>>, %arg7: memref<1x128xf32, #tpu.memory_space<vmem>>, %arg8: memref<16x128xf32, #tpu.memory_space<vmem>>) attributes {dimension_semantics = [#tpu.dimension_semantics<parallel>], iteration_bounds = array<i64: 2>, scalar_prefetch = 0 : i64, scratch_operands = 0 : i64, tpu.core_type = #tpu.core_type<tc>, window_params = [{transform_indices = @transform_0, window_bounds = array<i64: 16, 128>}, {pipeline_mode = #tpu.pipeline_mode<synchronous>, transform_indices = @transform_1, window_bounds = array<i64: 3, 128, 128>}, {pipeline_mode = #tpu.pipeline_mode<synchronous>, transform_indices = @transform_2, window_bounds = array<i64: 1, 128>}, {pipeline_mode = #tpu.pipeline_mode<synchronous>, transform_indices = @transform_3, window_bounds = array<i64: 1, 128>}, {pipeline_mode = #tpu.pipeline_mode<synchronous>, transform_indices = @transform_4, window_bounds = array<i64: 3, 128, 128>}, {pipeline_mode = #tpu.pipeline_mode<synchronous>, transform_indices = @transform_5, window_bounds = array<i64: 1, 128>}, {pipeline_mode = #tpu.pipeline_mode<synchronous>, transform_indices = @transform_6, window_bounds = array<i64: 1, 128>}, {transform_indices = @transform_7, window_bounds = array<i64: 16, 128>}]} {
    %c0 = arith.constant 0 : index
    %c0_0 = arith.constant 0 : index
    %0 = vector.load %arg1[%c0, %c0_0] : memref<16x128xf32, #tpu.memory_space<vmem>>, vector<16x128xf32>
    %1 = tpu.iota {dimensions = array<i32: 0>} : vector<16x1xi32>
    %c16_i32 = arith.constant 16 : i32
    %c0_i32 = arith.constant 0 : i32
    %2 = arith.cmpi eq, %c16_i32, %c0_i32 : i32
    %c1_i32 = arith.constant 1 : i32
    %3 = arith.select %2, %c1_i32, %c16_i32 : i32
    %4 = vector.broadcast %3 : i32 to vector<16x1xi32>
    %5 = arith.remsi %1, %4 : vector<16x1xi32>
    %c0_i32_1 = arith.constant 0 : i32
    %6 = vector.broadcast %c0_i32_1 : i32 to vector<16x1xi32>
    %7 = arith.cmpi ne, %5, %6 : vector<16x1xi32>
    %c0_i32_2 = arith.constant 0 : i32
    %8 = vector.broadcast %c0_i32_2 : i32 to vector<16x1xi32>
    %9 = arith.cmpi slt, %5, %8 : vector<16x1xi32>
    %c0_i32_3 = arith.constant 0 : i32
    %10 = arith.cmpi slt, %3, %c0_i32_3 : i32
    %11 = vector.broadcast %10 : i1 to vector<16x1xi1>
    %12 = vector.broadcast %11 : vector<16x1xi1> to vector<16x1xi1>
    %13 = arith.xori %9, %12 : vector<16x1xi1>
    %14 = arith.andi %13, %7 : vector<16x1xi1>
    %15 = vector.broadcast %3 : i32 to vector<16x1xi32>
    %16 = arith.addi %5, %15 : vector<16x1xi32>
    %17 = arith.select %14, %16, %5 : vector<16x1xi1>, vector<16x1xi32>
    %c0_i32_4 = arith.constant 0 : i32
    %18 = vector.broadcast %c0_i32_4 : i32 to vector<16x1xi32>
    %19 = arith.cmpi eq, %17, %18 : vector<16x1xi32>
    %c15_i32 = arith.constant 15 : i32
    %20 = vector.broadcast %c15_i32 : i32 to vector<16x1xi32>
    %21 = arith.cmpi eq, %17, %20 : vector<16x1xi32>
    %c1_i32_5 = arith.constant 1 : i32
    %22 = tpu.dynamic_rotate %0 by %c1_i32_5 dim 0 : vector<16x128xf32>, i32 -> vector<16x128xf32>
    %cst = arith.constant 0.000000e+00 : f32
    %23 = vector.shape_cast %19 : vector<16x1xi1> to vector<16x1xi1>
    %24 = vector.broadcast %23 : vector<16x1xi1> to vector<16x128xi1>
    %25 = vector.broadcast %cst : f32 to vector<16x128xf32>
    %26 = arith.select %24, %25, %22 : vector<16x128xi1>, vector<16x128xf32>
    %c15_i32_6 = arith.constant 15 : i32
    %27 = tpu.dynamic_rotate %0 by %c15_i32_6 dim 0 : vector<16x128xf32>, i32 -> vector<16x128xf32>
    %cst_7 = arith.constant 0.000000e+00 : f32
    %28 = vector.shape_cast %21 : vector<16x1xi1> to vector<16x1xi1>
    %29 = vector.broadcast %28 : vector<16x1xi1> to vector<16x128xi1>
    %30 = vector.broadcast %cst_7 : f32 to vector<16x128xf32>
    %31 = arith.select %29, %30, %27 : vector<16x128xi1>, vector<16x128xf32>
    %c0_8 = arith.constant 0 : index
    %c0_9 = arith.constant 0 : index
    %c0_10 = arith.constant 0 : index
    %32 = vector.load %arg2[%c0_8, %c0_9, %c0_10] : memref<3x128x128xf32, #tpu.memory_space<vmem>>, vector<1x128x128xf32>
    %33 = vector.shape_cast %32 : vector<1x128x128xf32> to vector<128x128xf32>
    %cst_11 = arith.constant dense<0.000000e+00> : vector<16x128xf32>
    %34 = tpu.matmul %26, %33, %cst_11 {dimension_numbers = #tpu.dot_dimension_numbers<[1], [0], [0], [1], [0, 0, 1, 1], [], []>} : vector<16x128xf32>, vector<128x128xf32>, vector<16x128xf32> -> vector<16x128xf32>
    %c1 = arith.constant 1 : index
    %c0_12 = arith.constant 0 : index
    %c0_13 = arith.constant 0 : index
    %35 = vector.load %arg2[%c1, %c0_12, %c0_13] : memref<3x128x128xf32, #tpu.memory_space<vmem>>, vector<1x128x128xf32>
    %36 = vector.shape_cast %35 : vector<1x128x128xf32> to vector<128x128xf32>
    %cst_14 = arith.constant dense<0.000000e+00> : vector<16x128xf32>
    %37 = tpu.matmul %0, %36, %cst_14 {dimension_numbers = #tpu.dot_dimension_numbers<[1], [0], [0], [1], [0, 0, 1, 1], [], []>} : vector<16x128xf32>, vector<128x128xf32>, vector<16x128xf32> -> vector<16x128xf32>
    %38 = arith.addf %34, %37 : vector<16x128xf32>
    %c2 = arith.constant 2 : index
    %c0_15 = arith.constant 0 : index
    %c0_16 = arith.constant 0 : index
    %39 = vector.load %arg2[%c2, %c0_15, %c0_16] : memref<3x128x128xf32, #tpu.memory_space<vmem>>, vector<1x128x128xf32>
    %40 = vector.shape_cast %39 : vector<1x128x128xf32> to vector<128x128xf32>
    %cst_17 = arith.constant dense<0.000000e+00> : vector<16x128xf32>
    %41 = tpu.matmul %31, %40, %cst_17 {dimension_numbers = #tpu.dot_dimension_numbers<[1], [0], [0], [1], [0, 0, 1, 1], [], []>} : vector<16x128xf32>, vector<128x128xf32>, vector<16x128xf32> -> vector<16x128xf32>
    %42 = arith.addf %38, %41 : vector<16x128xf32>
    %c0_18 = arith.constant 0 : index
    %c0_19 = arith.constant 0 : index
    %43 = vector.load %arg3[%c0_18, %c0_19] : memref<1x128xf32, #tpu.memory_space<vmem>>, vector<1x128xf32>
    %44 = vector.broadcast %43 : vector<1x128xf32> to vector<16x128xf32>
    %45 = arith.mulf %42, %44 : vector<16x128xf32>
    %c0_20 = arith.constant 0 : index
    %c0_21 = arith.constant 0 : index
    %46 = vector.load %arg4[%c0_20, %c0_21] : memref<1x128xf32, #tpu.memory_space<vmem>>, vector<1x128xf32>
    %47 = vector.broadcast %46 : vector<1x128xf32> to vector<16x128xf32>
    %48 = arith.addf %45, %47 : vector<16x128xf32>
    %cst_22 = arith.constant 0.000000e+00 : f32
    %49 = vector.broadcast %cst_22 : f32 to vector<16x128xf32>
    %50 = arith.maximumf %48, %49 : vector<16x128xf32>
    %c1_i32_23 = arith.constant 1 : i32
    %51 = tpu.dynamic_rotate %50 by %c1_i32_23 dim 0 : vector<16x128xf32>, i32 -> vector<16x128xf32>
    %cst_24 = arith.constant 0.000000e+00 : f32
    %52 = vector.shape_cast %19 : vector<16x1xi1> to vector<16x1xi1>
    %53 = vector.broadcast %52 : vector<16x1xi1> to vector<16x128xi1>
    %54 = vector.broadcast %cst_24 : f32 to vector<16x128xf32>
    %55 = arith.select %53, %54, %51 : vector<16x128xi1>, vector<16x128xf32>
    %c15_i32_25 = arith.constant 15 : i32
    %56 = tpu.dynamic_rotate %50 by %c15_i32_25 dim 0 : vector<16x128xf32>, i32 -> vector<16x128xf32>
    %cst_26 = arith.constant 0.000000e+00 : f32
    %57 = vector.shape_cast %21 : vector<16x1xi1> to vector<16x1xi1>
    %58 = vector.broadcast %57 : vector<16x1xi1> to vector<16x128xi1>
    %59 = vector.broadcast %cst_26 : f32 to vector<16x128xf32>
    %60 = arith.select %58, %59, %56 : vector<16x128xi1>, vector<16x128xf32>
    %c0_27 = arith.constant 0 : index
    %c0_28 = arith.constant 0 : index
    %c0_29 = arith.constant 0 : index
    %61 = vector.load %arg5[%c0_27, %c0_28, %c0_29] : memref<3x128x128xf32, #tpu.memory_space<vmem>>, vector<1x128x128xf32>
    %62 = vector.shape_cast %61 : vector<1x128x128xf32> to vector<128x128xf32>
    %cst_30 = arith.constant dense<0.000000e+00> : vector<16x128xf32>
    %63 = tpu.matmul %55, %62, %cst_30 {dimension_numbers = #tpu.dot_dimension_numbers<[1], [0], [0], [1], [0, 0, 1, 1], [], []>} : vector<16x128xf32>, vector<128x128xf32>, vector<16x128xf32> -> vector<16x128xf32>
    %c1_31 = arith.constant 1 : index
    %c0_32 = arith.constant 0 : index
    %c0_33 = arith.constant 0 : index
    %64 = vector.load %arg5[%c1_31, %c0_32, %c0_33] : memref<3x128x128xf32, #tpu.memory_space<vmem>>, vector<1x128x128xf32>
    %65 = vector.shape_cast %64 : vector<1x128x128xf32> to vector<128x128xf32>
    %cst_34 = arith.constant dense<0.000000e+00> : vector<16x128xf32>
    %66 = tpu.matmul %50, %65, %cst_34 {dimension_numbers = #tpu.dot_dimension_numbers<[1], [0], [0], [1], [0, 0, 1, 1], [], []>} : vector<16x128xf32>, vector<128x128xf32>, vector<16x128xf32> -> vector<16x128xf32>
    %67 = arith.addf %63, %66 : vector<16x128xf32>
    %c2_35 = arith.constant 2 : index
    %c0_36 = arith.constant 0 : index
    %c0_37 = arith.constant 0 : index
    %68 = vector.load %arg5[%c2_35, %c0_36, %c0_37] : memref<3x128x128xf32, #tpu.memory_space<vmem>>, vector<1x128x128xf32>
    %69 = vector.shape_cast %68 : vector<1x128x128xf32> to vector<128x128xf32>
    %cst_38 = arith.constant dense<0.000000e+00> : vector<16x128xf32>
    %70 = tpu.matmul %60, %69, %cst_38 {dimension_numbers = #tpu.dot_dimension_numbers<[1], [0], [0], [1], [0, 0, 1, 1], [], []>} : vector<16x128xf32>, vector<128x128xf32>, vector<16x128xf32> -> vector<16x128xf32>
    %71 = arith.addf %67, %70 : vector<16x128xf32>
    %c0_39 = arith.constant 0 : index
    %c0_40 = arith.constant 0 : index
    %72 = vector.load %arg6[%c0_39, %c0_40] : memref<1x128xf32, #tpu.memory_space<vmem>>, vector<1x128xf32>
    %73 = vector.broadcast %72 : vector<1x128xf32> to vector<16x128xf32>
    %74 = arith.mulf %71, %73 : vector<16x128xf32>
    %c0_41 = arith.constant 0 : index
    %c0_42 = arith.constant 0 : index
    %75 = vector.load %arg7[%c0_41, %c0_42] : memref<1x128xf32, #tpu.memory_space<vmem>>, vector<1x128xf32>
    %76 = vector.broadcast %75 : vector<1x128xf32> to vector<16x128xf32>
    %77 = arith.addf %74, %76 : vector<16x128xf32>
    %78 = arith.addf %77, %0 : vector<16x128xf32>
    %cst_43 = arith.constant 0.000000e+00 : f32
    %79 = vector.broadcast %cst_43 : f32 to vector<16x128xf32>
    %80 = arith.maximumf %78, %79 : vector<16x128xf32>
    %c0_44 = arith.constant 0 : index
    %c0_45 = arith.constant 0 : index
    %81 = vector.load %arg8[%c0_44, %c0_45] : memref<16x128xf32, #tpu.memory_space<vmem>>, vector<16x128xf32>
    tpu.vector_store %arg8[%c0_44, %c0_45], %80 {strides = array<i32>} : memref<16x128xf32, #tpu.memory_space<vmem>>, vector<16x128xf32>,
    return
  }
  func.func @transform_0(%arg0: i32) -> (i32, i32) {
    %c0_i32 = arith.constant 0 : i32
    %c0_i32_0 = arith.constant 0 : i32
    return %arg0, %c0_i32 : i32, i32
  }
  func.func @transform_1(%arg0: i32) -> (i32, i32, i32) {
    %c0_i32 = arith.constant 0 : i32
    %c0_i32_0 = arith.constant 0 : i32
    %c0_i32_1 = arith.constant 0 : i32
    %c0_i32_2 = arith.constant 0 : i32
    return %c0_i32, %c0_i32_0, %c0_i32_1 : i32, i32, i32
  }
  func.func @transform_2(%arg0: i32) -> (i32, i32) {
    %c0_i32 = arith.constant 0 : i32
    %c0_i32_0 = arith.constant 0 : i32
    %c0_i32_1 = arith.constant 0 : i32
    return %c0_i32, %c0_i32_0 : i32, i32
  }
  func.func @transform_3(%arg0: i32) -> (i32, i32) {
    %c0_i32 = arith.constant 0 : i32
    %c0_i32_0 = arith.constant 0 : i32
    %c0_i32_1 = arith.constant 0 : i32
    return %c0_i32, %c0_i32_0 : i32, i32
  }
  func.func @transform_4(%arg0: i32) -> (i32, i32, i32) {
    %c0_i32 = arith.constant 0 : i32
    %c0_i32_0 = arith.constant 0 : i32
    %c0_i32_1 = arith.constant 0 : i32
    %c0_i32_2 = arith.constant 0 : i32
    return %c0_i32, %c0_i32_0, %c0_i32_1 : i32, i32, i32
  }
  func.func @transform_5(%arg0: i32) -> (i32, i32) {
    %c0_i32 = arith.constant 0 : i32
    %c0_i32_0 = arith.constant 0 : i32
    %c0_i32_1 = arith.constant 0 : i32
    return %c0_i32, %c0_i32_0 : i32, i32
  }
  func.func @transform_6(%arg0: i32) -> (i32, i32) {
    %c0_i32 = arith.constant 0 : i32
    %c0_i32_0 = arith.constant 0 : i32
    %c0_i32_1 = arith.constant 0 : i32
    return %c0_i32, %c0_i32_0 : i32, i32
  }
  func.func @transform_7(%arg0: i32) -> (i32, i32) {
    %c0_i32 = arith.constant 0 : i32
    %c0_i32_0 = arith.constant 0 : i32
    return %arg0, %c0_i32 : i32, i32
  }
}

</mosaic_0001>

<bundles_post_ra>
// kernel: tpu_custom_call.1
= control target key start
LH: loop header
LB: loop body
LE: loop exit
PB: predicated region body
PF: predicated region fallthrough
CT: control target
= control target key end

     0   :  { %12 = vsyncpa [#allocation3], 0  ;;  %s2252_s0 = inlined_call_operand.hbm [shape: f32[32,128], index: 0, kind: input, shape index: {}]   ;;  %s2253_s1 = inlined_call_operand.hbm [shape: f32[3,128,128], index: 1, kind: input, shape index: {}]   ;;  %s2254_s2 = inlined_call_operand.vmem [shape: f32[1,128], index: 2, kind: input, shape index: {}]   ;;  %s2255_s3 = inlined_call_operand.vmem [shape: f32[1,128], index: 3, kind: input, shape index: {}]   ;;  %s2256_s4 = inlined_call_operand.hbm [shape: f32[3,128,128], index: 4, kind: input, shape index: {}]   ;;  %s2257_s5 = inlined_call_operand.vmem [shape: f32[1,128], index: 5, kind: input, shape index: {}]   ;;  %s2258_s6 = inlined_call_operand.vmem [shape: f32[1,128], index: 6, kind: input, shape index: {}]   ;;  %s2259_s7 = inlined_call_operand.hbm [shape: f32[32,128], index: 7, kind: output, shape index: {}]  }
   0x1   :  { %14 = vsyncpa [#allocation3 + $0x1], 0 }
   0x2   :  { %15 = vsyncpa [#allocation6], 0 }
   0x3   :  { %16 = vsyncpa [#allocation4], 0 }
   0x4   :  { %18 = vsyncpa [#allocation4 + $0x1], 0  ;;  %s1928_s24 = smov 0   ;;  %s1930_s25 = smov 0  }
   0x5   :  { %s1932_s26 = smov 0   ;;  %s1934_s27 = smov 0  }
   0x6 LB: > { %s1949_s28 = sadd.s32 4294967295, %s1878_s27   ;;  %s1099_s29 = sadd.s32 4294967294, %s1878_s27   ;;  %s1878_s27 = sphi %s1934_s27, %s2285_s27   ;;  %s1874_s26 = sphi %s1932_s26, %s2284_s26   ;;  %s1870_s25 = sphi %s1930_s25, %s2283_s25   ;;  %s1866_s24 = sphi %s1928_s24, %s2282_s24  }
   0x7   : > { %p44_p0 = scmp.ne.s32.totalorder %s1870_s25, %s1866_s24  ;;  %p2260_p1 = scmp.eq.s32.totalorder %s1949_s28, 0 }
   0x8   : > { %p200_p3 = scmp.eq.s32.totalorder %s1099_s29, 1  ;;  %p1100_p5 = scmp.ge.s32.totalorder %s1878_s27, 1 }
   0x9   : > { %p1958_p4 = por %p2260_p1, %p44_p0  ;;  %p207_p7 = scmp.lt.s32.totalorder %s1878_s27, 3 }
   0xa   : > { %p1963_p6 = por %p200_p3, %p44_p0  ;;  %s1880_s10 = smov [#allocation5]  }
   0xb   : > { %s2264_s30 = scalar_select %p1958_p4, 1, 0 }
   0xc   : > { %s2265_s8 = scalar_select %p1963_p6, 1, 0 }
   0xd   : > { %p1968_p8 = pnand %p1100_p5, %p207_p7  ;;  %s219_s11 = sshll.u32 %s1880_s10, 4  ;;  %s1972_s11 = int_to_ptr.vmem [resolvable:$true] %s219_s11 }
   0xe   : > { %s1881_s13 = smov [#allocation7]   ;;  %s1722_s17 = scalar_lea.hbm %s2253_s1, 6144 }
   0xf   : > { %p1663_p9 = pneg %p1968_p8  ;;  %s238_s14 = sshll.u32 %s1881_s13, 4  ;;  %s1983_s14 = int_to_ptr.vmem [resolvable:$true] %s238_s14 }
  0x10   : > { %p1723_p12 = scmp.ne.s32.totalorder %s2253_s1, %s1722_s17  ;;  %p1729_p5 = scmp.lt.u32.totalorder %s1722_s17, %s2253_s1 }
  0x11   : > { %p1979_p11 = pnand %p1663_p9, %p2260_p1 }
  0x13   : > { %p1724_p13 = pneg %p1979_p11 }
  0x15   : > { %p1725_p0 = pnand %p1724_p13, %p1723_p12 }
  0x17   : > { %p1726_p3 = pneg %p1725_p0 }
  0x19   : > { %p1731_p7 = pnand %p1729_p5, %p1726_p3 }
  0x1b   : > { %1734 = shalt.err (!%p1731_p7)
}
  0x1c   : > { %s1735_s22 = scalar_lea.vmem %s1972_s11, 6144  ;;  %p1743_p2 = scmp.lt.s32.totalorder %s1972_s11, %s1972_s11 }
  0x1d   : > { %p1736_p9 = scmp.ne.s32.totalorder %s1972_s11, %s1735_s22  ;;  %p1744_p12 = scmp.lt.s32.totalorder %s1735_s22, %s1735_s22 }
  0x1f   : > { %p1738_p10 = pnand %p1736_p9, %p1724_p13  ;;  %p1745_p0 = por %p1744_p12, %p1743_p2 }
  0x21   : > { %p1739_p1 = pneg %p1738_p10 }
  0x23   : > { %p1746_p6 = pnand %p1745_p0, %p1739_p1 }
  0x25   : > { %1749 = shalt.err (!%p1746_p6)
}
  0x26   : > { %s2261_s23 = smov 128   ;;  %s1883_s29 = smov 8  }
  0x27   : > { %1666 = dma.hbm_to_vmem [thread:$0]  (!%p1979_p11), %s2253_s1, 6144, %s1972_s11, [#allocation6], %s2261_s23, %s2261_s23, %s1883_s29  }
  0x28   : > { %s1750_s17 = scalar_lea.hbm %s2256_s4, 6144 }
  0x29   : > { %p1751_p1 = scmp.ne.s32.totalorder %s2256_s4, %s1750_s17  ;;  %p1757_p10 = scmp.lt.u32.totalorder %s1750_s17, %s2256_s4 }
  0x2b   : > { %p1753_p2 = pnand %p1751_p1, %p1724_p13 }
  0x2d   : > { %p1754_p6 = pneg %p1753_p2 }
  0x2f   : > { %p1759_p3 = pnand %p1757_p10, %p1754_p6 }
  0x31   : > { %1762 = shalt.err (!%p1759_p3)
}
  0x32   : > { %s1763_s11 = scalar_lea.vmem %s1983_s14, 6144  ;;  %p1771_p12 = scmp.lt.s32.totalorder %s1983_s14, %s1983_s14 }
  0x33   : > { %p1764_p5 = scmp.ne.s32.totalorder %s1983_s14, %s1763_s11  ;;  %p1772_p0 = scmp.lt.s32.totalorder %s1763_s11, %s1763_s11 }
  0x35   : > { %p1766_p7 = pnand %p1764_p5, %p1724_p13  ;;  %p1773_p1 = por %p1772_p0, %p1771_p12 }
  0x37   : > { %p1767_p9 = pneg %p1766_p7 }
  0x39   : > { %p1774_p2 = pnand %p1773_p1, %p1767_p9 }
  0x3b   : > { %1777 = shalt.err (!%p1774_p2)
}
  0x3c   : > { %1669 = dma.hbm_to_vmem [thread:$0]  (!%p1979_p11), %s2256_s4, 6144, %s1983_s14, [#allocation6], %s2261_s23, %s2261_s23, %s1883_s29  }
  0x3d   : > { %s2044_s12 = sadd.s32 1, %s1878_s27   ;;  %s31_s13 = sadd.s32 1, %s1874_s26 }
  0x3e   : > { %s28_s15 = ssub.s32 %s1878_s27, %s2044_s12  ;;  %p38_p13 = scmp.ne.s32.totalorder %s1874_s26, %s1870_s25 }
  0x3f   : > { %p29_p6 = scmp.eq.s32.totalorder %s28_s15, 0  ;;  %p39_p10 = scmp.eq.s32.totalorder %s1878_s27, 0 }
  0x40   : > { %p2268_p3 = scmp.eq.s32.totalorder %s1949_s28, 1  ;;  %p1680_p7 = scmp.lt.s32.totalorder %s1878_s27, 2 }
  0x41   : > { %s2060_s17 = scalar_select %p29_p6, %s1874_s26, %s31_s13  }
  0x42   : > { %p2054_p5 = por %p2268_p3, %p38_p13  ;;  %p40_p9 = por %p39_p10, %p38_p13 }
  0x43   : > { %s258_s18 = sand.u32 1, %s1874_s26   ;;  %s1129_s14 = sshll.u32 %s1878_s27, 8 }
  0x44   : > { %s2269_s16 = scalar_select %p2054_p5, 1, 0 }
  0x45   : > { %s1104_s19 = sshll.u32 %s258_s18, 4  ;;  %s2067_s11 = scalar_lea.hbm %s2252_s0, %s1129_s14 }
  0x46   : > { %s262_s22 = scalar_lea.vmem [#allocation2], %s1104_s19  ;;  %p2071_p11 = pnand %p1680_p7, %p40_p9 }
  0x47   : > { %s269_s10 = sshll.u32 %s262_s22, 4  ;;  %s2075_s15 = scalar_lea.sflag [#allocation3], %s258_s18  ;;  %s2069_s10 = int_to_ptr.vmem [resolvable:$true] %s269_s10 }
  0x48   : > { %s1778_s23 = scalar_lea.hbm %s2067_s11, 256  ;;  %p1780_p0 = pneg %p2071_p11 }
  0x49   : > { %p1779_p12 = scmp.ne.s32.totalorder %s2067_s11, %s1778_s23  ;;  %s1783_s20 = scalar_lea.hbm %s2252_s0, 512 }
  0x4a   : > { %p1784_p13 = scmp.lt.u32.totalorder %s2067_s11, %s2252_s0  ;;  %p1785_p6 = scmp.lt.u32.totalorder %s1783_s20, %s1778_s23 }
  0x4b   : > { %p1781_p1 = pnand %p1780_p0, %p1779_p12  ;;  %p1787_p3 = scmp.lt.u32.totalorder %s1778_s23, %s2067_s11 }
  0x4c   : > { %p1786_p10 = por %p1785_p6, %p1784_p13 }
  0x4d   : > { %p1782_p2 = pneg %p1781_p1 }
  0x4e   : > { %p1788_p7 = por %p1787_p3, %p1786_p10 }
  0x50   : > { %p1789_p9 = pnand %p1788_p7, %p1782_p2 }
  0x52   : > { %1792 = shalt.err (!%p1789_p9)
}
  0x53   : > { %s1793_s18 = scalar_lea.vmem %s2069_s10, 256  ;;  %s1884_s19 = smov [#allocation2]  }
  0x54   : > { %p1794_p12 = scmp.ne.s32.totalorder %s2069_s10, %s1793_s18  ;;  %s1798_s14 = sshll.u32 %s1884_s19, 4  ;;  %s1799_s14 = int_to_ptr.vmem [resolvable:$false] %s1798_s14 }
  0x55   : > { %s1800_s21 = scalar_lea.vmem %s1799_s14, 512  ;;  %p1801_p4 = scmp.lt.s32.totalorder %s2069_s10, %s1799_s14 }
  0x56   : > { %p1796_p1 = pnand %p1794_p12, %p1780_p0  ;;  %p1802_p13 = scmp.lt.s32.totalorder %s1800_s21, %s1793_s18 }
  0x58   : > { %p1797_p5 = pneg %p1796_p1  ;;  %p1803_p6 = por %p1802_p13, %p1801_p4 }
  0x5a   : > { %p1804_p10 = pnand %p1803_p6, %p1797_p5 }
  0x5c   : > { %1807 = shalt.err (!%p1804_p10)
}
  0x5d   : > { %s2271_s23 = smov 128   ;;  %281 = sbr.rel (%p1968_p8) target bundleno = 723 (0x2d3), region = 48 }
  0x5e   : > { %1673 = dma.hbm_to_vmem [thread:$0]  (!%p2071_p11), %s2067_s11, 256, %s2069_s10, %s2075_s15, %s2271_s23, %s2271_s23, %s1883_s29  }
  0x5f   : > { %s2109_s20 = sand.u32 (!%p1968_p8), 1, %s1870_s25   ;;  %p2272_p4 = scmp.ne.s32.totalorder (!%p1968_p8), %s2264_s30, 0 }
  0x60   : > { %s1108_s22 = sshll.u32 (!%p1968_p8), %s2109_s20, 4  ;;  %s284_s18 = scalar_lea.sflag (!%p1968_p8), [#allocation3], %s2109_s20 }
  0x61   : > { %s2115_s13 = scalar_lea.vmem (!%p1968_p8), [#allocation2], %s1108_s22 }
  0x64   : > { %1853 = dma.done.wait (%p2272_p4), %s284_s18, 256  }
  0x65   : > { %1855 = vsyncadd (%p2272_p4), %s284_s18, 4294967040  ;;  %p2273_p5 = scmp.eq.s32.totalorder %s1949_s28, 0 }
  0x67   : > { %1857 = dma.done.wait (%p2273_p5), [#allocation6], 12288   ;;  %p2274_p8 = pmov %p2273_p5 }
  0x68   : > { %v400_v0 = vld [vmem:[#allocation5 + $0x80] sm:$0xff]  ;;  %v401_v1 = vld [vmem:[#allocation5 + $0x88] sm:$0xff]  ;;  %v402_v2 = vld [vmem:[#allocation5 + $0x90] sm:$0xff]  ;;  %v330_v30 = vlaneseq  ;;  %s325_s21 = scalar_lea.vmem [#allocation8], %s1108_s22  ;;  %s1130_s18 = sshll.u32 %s1949_s28, 8 }
  0x69   : > { %1859 = vsyncadd (%p2274_p8), [#allocation6], 4294955008  ;;  %v1451_v3 = vpack.c.bf16 %v401_v1, %v400_v0  ;;  %v403_v4 = vld [vmem:[#allocation5 + $0x98] sm:$0xff]  ;;  %v404_v6 = vld [vmem:[#allocation5 + $0xa0] sm:$0xff]  ;;  %s1007_s23 = sshll.u32 %s325_s21, 4  ;;  %s2208_s9 = scalar_lea.hbm %s2259_s7, %s1130_s18  ;;  %s2202_s23 = int_to_ptr.vmem [resolvable:$true] %s1007_s23 }
  0x6a   : > { %v1455_v5 = vpack.c.bf16 %v403_v4, %v402_v2  ;;  %v405_v7 = vld [vmem:[#allocation5 + $0xa8] sm:$0xff]  ;;  %v2126_v9 = vld [vmem:[%s2115_s13] sm:$0xff]  ;;  %v407_v11 = vld [vmem:[#allocation5 + $0xb8] sm:$0xff]  ;;  %v2129_v37 = vshrl.u32 %v330_v30, 7  ;;  %s994_s22 = scalar_lea.sflag [#allocation4], %s2109_s20  ;;  %s1808_s28 = scalar_lea.vmem %s2202_s23, 256 }
  0x6b   : > { %1452 = vmatprep.subr.bf16.mxu0 %v1451_v3  ;;  %v1459_v8 = vpack.c.bf16 %v405_v7, %v404_v6  ;;  %v406_v10 = vld [vmem:[#allocation5 + $0xb0] sm:$0xff]  ;;  %1273 = vmatprep.mubr.f32.mxu0 %v2126_v9  ;;  %v408_v13 = vld [vmem:[#allocation5 + $0xc0] sm:$0xff]  ;;  %v409_v14 = vld [vmem:[#allocation5 + $0xc8] sm:$0xff]  ;;  %v361_v44 = vrot.slane %v2126_v9, 7  ;;  %p1809_p11 = scmp.ne.s32.totalorder %s2202_s23, %s1808_s28  ;;  %p2279_p0 = scmp.ne.s32.totalorder %s2269_s16, 0 }
  0x6c   : > { %1454 = vmatpush3.bf16.msra.mxu0 %v1451_v3  ;;  %v1463_v12 = vpack.c.bf16 %v407_v11, %v406_v10  ;;  %v1467_v15 = vpack.c.bf16 %v409_v14, %v408_v13  ;;  %v410_v16 = vld [vmem:[#allocation5 + $0xd0] sm:$0xff]  ;;  %v411_v17 = vld [vmem:[#allocation5 + $0xd8] sm:$0xff]  ;;  %v709_v18 = vld [vmem:[#allocation7 + $0x80] sm:$0xff]  ;;  %v337_v47 = vand.u32 15, %v2129_v37  ;;  %vm363_vm0 = vcmp.lt.s32.totalorder %v2129_v37, 1  ;;  %s1885_s29 = smov [#allocation8]  }
  0x6d   : > { %1456 = vmatprep.subr.bf16.mxu0 %v1455_v5  ;;  %v1471_v19 = vpack.c.bf16 %v411_v17, %v410_v16  ;;  %v710_v20 = vld [vmem:[#allocation7 + $0x88] sm:$0xff]  ;;  %v711_v21 = vld [vmem:[#allocation7 + $0x90] sm:$0xff]  ;;  %v712_v22 = vld [vmem:[#allocation7 + $0x98] sm:$0xff]  ;;  %vm374_vm2 = vcmp.lt.s32.totalorder %v2129_v37, 7  ;;  %p1810_p2 = pnand %p1809_p11, %p2279_p0  ;;  %s1812_s11 = sshll.u32 %s1885_s29, 4  ;;  %s1813_s11 = int_to_ptr.vmem [resolvable:$false] %s1812_s11 }
  0x6e   : > { %v412_v23 = vld [vmem:[#allocation5 + $0xe0] sm:$0xff]  ;;  %v413_v24 = vld [vmem:[#allocation5 + $0xe8] sm:$0xff]  ;;  %v1547_v25 = vpack.c.bf16 %v710_v20, %v709_v18  ;;  %v1551_v26 = vpack.c.bf16 %v712_v22, %v711_v21  ;;  %v414_v31 = vld [vmem:[#allocation5 + $0xf0] sm:$0xff]  ;;  %vm2144_vm1 = vcmp.ne.s32.totalorder %v337_v47, 0  ;;  %s1814_s10 = scalar_lea.vmem %s1813_s11, 512  ;;  %p1815_p7 = scmp.lt.s32.totalorder %s2202_s23, %s1813_s11 }
  0x6f   : > { %v713_v27 = vld [vmem:[#allocation7 + $0xa0] sm:$0xff]  ;;  %v714_v28 = vld [vmem:[#allocation7 + $0xa8] sm:$0xff]  ;;  %v1475_v29 = vpack.c.bf16 %v413_v24, %v412_v23  ;;  %v415_v32 = vld [vmem:[#allocation5 + $0xf8] sm:$0xff]  ;;  %p1811_p3 = pneg %p1810_p2  ;;  %p1816_p9 = scmp.lt.s32.totalorder %s1814_s10, %s1808_s28 }
  0x70   : > { %1458 = vmatpush3.bf16.msra.mxu0 %v1455_v5  ;;  %1548 = vmatprep.subr.bf16.mxu1 %v1547_v25  ;;  %v1555_v33 = vpack.c.bf16 %v714_v28, %v713_v27  ;;  %v715_v34 = vld [vmem:[#allocation7 + $0xb0] sm:$0xff]  ;;  %v716_v35 = vld [vmem:[#allocation7 + $0xb8] sm:$0xff]  ;;  %v1479_v36 = vpack.c.bf16 %v415_v32, %v414_v31  ;;  %v383_v38 = vld [vmem:[#allocation5] sm:$0xff] }
  0x71   : > { %1460 = vmatprep.subr.bf16.mxu0 %v1459_v8  ;;  %1550 = vmatpush3.bf16.msra.mxu1 %v1547_v25  ;;  %v384_v39 = vld [vmem:[#allocation5 + $0x8] sm:$0xff]  ;;  %v1559_v40 = vpack.c.bf16 %v716_v35, %v715_v34  ;;  %v717_v41 = vld [vmem:[#allocation7 + $0xc0] sm:$0xff]  ;;  %v385_v48 = vld [vmem:[#allocation5 + $0x10] sm:$0xff]  ;;  %p1817_p12 = por %p1816_p9, %p1815_p7 }
  0x72   : > { %1552 = vmatprep.subr.bf16.mxu1 %v1551_v26  ;;  %v718_v42 = vld [vmem:[#allocation7 + $0xc8] sm:$0xff]  ;;  %v1483_v45 = vpack.c.bf16 %v384_v39, %v383_v38  ;;  %v386_v49 = vld [vmem:[#allocation5 + $0x18] sm:$0xff]  ;;  %v719_v51 = vld [vmem:[#allocation7 + $0xd0] sm:$0xff] }
  0x73   : > { %v2132_v43 = vld [vmem:[%s2115_s13 + $0x8] sm:$0xff]  ;;  %v1563_v50 = vpack.c.bf16 %v718_v42, %v717_v41  ;;  %v1487_v53 = vpack.c.bf16 %v386_v49, %v385_v48  ;;  %v387_v56 = vld [vmem:[#allocation5 + $0x20] sm:$0xff]  ;;  %v389_v60 = vld [vmem:[#allocation5 + $0x30] sm:$0xff]  ;;  %p1818_p1 = pnand %p1817_p12, %p1811_p3 }
  0x74   : > { %1462 = vmatpush3.bf16.msra.mxu0 %v1459_v8  ;;  %v362_v46 = vrot.slane %v2132_v43, 7  ;;  %v720_v52 = vld [vmem:[#allocation7 + $0xd8] sm:$0xff]  ;;  %v388_v57 = vld [vmem:[#allocation5 + $0x28] sm:$0xff]  ;;  %v391_v63 = vld [vmem:[#allocation5 + $0x40] sm:$0xff]  ;;  %v373_v16 = vrot.slane %v2132_v43, 1 }
  0x75   : > { %1464 = vmatprep.subr.bf16.mxu0 %v1463_v12  ;;  %1554 = vmatpush3.bf16.msra.mxu1 %v1551_v26  ;;  %v1567_v58 = vpack.c.bf16 %v720_v52, %v719_v51  ;;  %v1491_v59 = vpack.c.bf16 %v388_v57, %v387_v56  ;;  %v390_v61 = vld [vmem:[#allocation5 + $0x38] sm:$0xff]  ;;  %v392_v0 = vld [vmem:[#allocation5 + $0x48] sm:$0xff]  ;;  %v393_v2 = vld [vmem:[#allocation5 + $0x50] sm:$0xff] }
  0x76   : > { %1556 = vmatprep.subr.bf16.mxu1 %v1555_v33  ;;  %v365_v54 = vsel %vm363_vm0, %v362_v46, %v361_v44  ;;  %v1495_v62 = vpack.c.bf16 %v390_v61, %v389_v60  ;;  %v1499_v1 = vpack.c.bf16 %v392_v0, %v391_v63  ;;  %v394_v3 = vld [vmem:[#allocation5 + $0x58] sm:$0xff]  ;;  %v395_v5 = vld [vmem:[#allocation5 + $0x60] sm:$0xff]  ;;  %v396_v6 = vld [vmem:[#allocation5 + $0x68] sm:$0xff] }
  0x77   : > { %v1503_v4 = vpack.c.bf16 %v394_v3, %v393_v2  ;;  %v1507_v7 = vpack.c.bf16 %v396_v6, %v395_v5  ;;  %v397_v8 = vld [vmem:[#allocation5 + $0x70] sm:$0xff]  ;;  %v398_v10 = vld [vmem:[#allocation5 + $0x78] sm:$0xff]  ;;  %v568_v13 = vld [vmem:[#allocation5 + $0x108] sm:$0xff] }
  0x78   : > { %1466 = vmatpush3.bf16.msra.mxu0 %v1463_v12  ;;  %v1511_v11 = vpack.c.bf16 %v398_v10, %v397_v8  ;;  %v567_v12 = vld [vmem:[#allocation5 + $0x100] sm:$0xff]  ;;  %v569_v17 = vld [vmem:[#allocation5 + $0x110] sm:$0xff]  ;;  %v570_v18 = vld [vmem:[#allocation5 + $0x118] sm:$0xff] }
  0x79   : > { %1468 = vmatprep.subr.bf16.mxu0 %v1467_v15  ;;  %1558 = vmatpush3.bf16.msra.mxu1 %v1555_v33  ;;  %v1515_v14 = vpack.c.bf16 %v568_v13, %v567_v12  ;;  %v1519_v20 = vpack.c.bf16 %v570_v18, %v569_v17  ;;  %v571_v22 = vld [vmem:[#allocation5 + $0x120] sm:$0xff]  ;;  %v572_v23 = vld [vmem:[#allocation5 + $0x128] sm:$0xff]  ;;  %v573_v25 = vld [vmem:[#allocation5 + $0x130] sm:$0xff] }
  0x7a   : > { %1560 = vmatprep.subr.bf16.mxu1 %v1559_v40  ;;  %v1523_v24 = vpack.c.bf16 %v572_v23, %v571_v22  ;;  %v574_v26 = vld [vmem:[#allocation5 + $0x138] sm:$0xff]  ;;  %v575_v28 = vld [vmem:[#allocation5 + $0x140] sm:$0xff]  ;;  %v577_v31 = vld [vmem:[#allocation5 + $0x150] sm:$0xff] }
  0x7b   : > { %v1527_v27 = vpack.c.bf16 %v574_v26, %v573_v25  ;;  %v578_v32 = vld [vmem:[#allocation5 + $0x158] sm:$0xff]  ;;  %v579_v34 = vld [vmem:[#allocation5 + $0x160] sm:$0xff]  ;;  %v580_v35 = vld [vmem:[#allocation5 + $0x168] sm:$0xff] }
  0x7c   : > { %1470 = vmatpush3.bf16.msra.mxu0 %v1467_v15  ;;  %v372_v15 = vrot.slane %v2126_v9, 1  ;;  %v1535_v33 = vpack.c.bf16 %v578_v32, %v577_v31  ;;  %v581_v38 = vld [vmem:[#allocation5 + $0x170] sm:$0xff]  ;;  %v582_v39 = vld [vmem:[#allocation5 + $0x178] sm:$0xff]  ;;  %v722_v47 = vld [vmem:[#allocation7 + $0xe8] sm:$0xff] }
  0x7d   : > { %1472 = vmatprep.subr.bf16.mxu0 %v1471_v19  ;;  %1562 = vmatpush3.bf16.msra.mxu1 %v1559_v40  ;;  %v332_v40 = vadd.s32 8, %v2129_v37  ;;  %v1543_v41 = vpack.c.bf16 %v582_v39, %v581_v38  ;;  %v723_v49 = vld [vmem:[#allocation7 + $0xf0] sm:$0xff]  ;;  %v692_v52 = vld [vmem:[#allocation7] sm:$0xff]  ;;  %v697_v10 = vld [vmem:[#allocation7 + $0x28] sm:$0xff] }
  0x7e   : > { %1564 = vmatprep.subr.bf16.mxu1 %v1563_v50  ;;  %v375_v21 = vsel %vm374_vm2, %v372_v15, %v373_v16  ;;  %v1116_v56 = vld [vmem:[%s2254_s2] ss:$0 sm:$0xff]  ;;  %v694_v0 = vld [vmem:[#allocation7 + $0x10] sm:$0xff]  ;;  %v699_v18 = vld [vmem:[#allocation7 + $0x38] sm:$0xff] }
  0x7f   : > { %v344_v42 = vand.u32 15, %v332_v40  ;;  %v696_v8 = vld [vmem:[#allocation7 + $0x20] sm:$0xff]  ;;  %v698_v17 = vld [vmem:[#allocation7 + $0x30] sm:$0xff]  ;;  %v705_v55 = vld [vmem:[#allocation7 + $0x68] sm:$0xff] }
  0x80   : > { %1474 = vmatpush3.bf16.msra.mxu0 %v1471_v19  ;;  %v364_v19 = vsel %vm363_vm0, %v361_v44, %v362_v46  ;;  %v376_v44 = vsel %vm374_vm2, %v373_v16, %v372_v15  ;;  %v721_v46 = vld [vmem:[#allocation7 + $0xe0] sm:$0xff]  ;;  %v1587_v16 = vpack.c.bf16 %v697_v10, %v696_v8  ;;  %v702_v23 = vld [vmem:[#allocation7 + $0x50] sm:$0xff]  ;;  %v877_v31 = vld [vmem:[#allocation7 + $0x108] sm:$0xff] }
  0x81   : > { %1476 = vmatprep.subr.bf16.mxu0 %v1475_v29  ;;  %1566 = vmatpush3.bf16.msra.mxu1 %v1563_v50  ;;  %vm2165_vm3 = vcmp.ne.s32.totalorder %v344_v42, 15  ;;  %v1571_v48 = vpack.c.bf16 %v722_v47, %v721_v46  ;;  %v724_v50 = vld [vmem:[#allocation7 + $0xf8] sm:$0xff]  ;;  %v704_v25 = vld [vmem:[#allocation7 + $0x60] sm:$0xff]  ;;  %v881_v38 = vld [vmem:[#allocation7 + $0x128] sm:$0xff] }
  0x82   : > { %1568 = vmatprep.subr.bf16.mxu1 %v1567_v58  ;;  %v1575_v51 = vpack.c.bf16 %v724_v50, %v723_v49  ;;  %v1603_v26 = vpack.c.bf16 %v705_v55, %v704_v25  ;;  %v882_v40 = vld [vmem:[#allocation7 + $0x130] sm:$0xff]  ;;  %v885_v46 = vld [vmem:[#allocation7 + $0x148] sm:$0xff]  ;;  %v887_v49 = vld [vmem:[#allocation7 + $0x158] sm:$0xff] }
  0x84   : > { %1478 = vmatpush3.bf16.msra.mxu0 %v1475_v29  ;;  %v576_v29 = vld [vmem:[#allocation5 + $0x148] sm:$0xff] }
  0x85   : > { %1480 = vmatprep.subr.bf16.mxu0 %v1479_v36  ;;  %1570 = vmatpush3.bf16.msra.mxu1 %v1567_v58  ;;  %v1531_v30 = vpack.c.bf16 %v576_v29, %v575_v28  ;;  %v1117_v58 = vld [vmem:[%s2255_s3] ss:$0 sm:$0xff]  ;;  %v707_v28 = vld [vmem:[#allocation7 + $0x78] sm:$0xff] }
  0x86   : > { %1572 = vmatprep.subr.bf16.mxu1 %v1571_v48 }
  0x88   : > { %1482 = vmatpush3.bf16.msra.mxu0 %v1479_v36  ;;  %v1539_v36 = vpack.c.bf16 %v580_v35, %v579_v34  ;;  %v879_v34 = vld [vmem:[#allocation7 + $0x118] sm:$0xff] }
  0x89   : > { %1484 = vmatprep.subr.bf16.mxu0 %v1483_v45  ;;  %1574 = vmatpush3.bf16.msra.mxu1 %v1571_v48  ;;  %v886_v48 = vld [vmem:[#allocation7 + $0x150] sm:$0xff] }
  0x8a   : > { %1576 = vmatprep.subr.bf16.mxu1 %v1575_v51  ;;  %v1631_v50 = vpack.c.bf16 %v887_v49, %v886_v48 }
  0x8b   : > { %1274 = vmatmul.mubr.f32.vlgmr.msra.gmra.mrb[0].mxu0 %v2132_v43 }
  0x8c   : > { %1486 = vmatpush3.bf16.msra.mxu0 %v1483_v45  ;;  %1308 = vmatprep.mubr.msk.f32.mxu0 %vm2144_vm1, %v365_v54 }
  0x8d   : > { %1488 = vmatprep.subr.bf16.mxu0 %v1487_v53  ;;  %1578 = vmatpush3.bf16.msra.mxu1 %v1575_v51  ;;  %v888_v51 = vld [vmem:[#allocation7 + $0x160] sm:$0xff] }
  0x90   : > { %1490 = vmatpush3.bf16.msra.mxu0 %v1487_v53  ;;  %v693_v53 = vld [vmem:[#allocation7 + $0x8] sm:$0xff] }
  0x91   : > { %1492 = vmatprep.subr.bf16.mxu0 %v1491_v59  ;;  %v1579_v54 = vpack.c.bf16 %v693_v53, %v692_v52  ;;  %v889_v52 = vld [vmem:[#allocation7 + $0x168] sm:$0xff] }
  0x92   : > { %v1635_v53 = vpack.c.bf16 %v889_v52, %v888_v51 }
  0x93   : > { %1580 = vmatprep.subr.bf16.mxu1 %v1579_v54 }
  0x94   : > { %1494 = vmatpush3.bf16.msra.mxu0 %v1491_v59 }
  0x95   : > { %1496 = vmatprep.subr.bf16.mxu0 %v1495_v62 }
  0x98   : > { %1498 = vmatpush3.bf16.msra.mxu0 %v1495_v62 }
  0x99   : > { %1500 = vmatprep.subr.bf16.mxu0 %v1499_v1 }
  0x9c   : > { %1502 = vmatpush3.bf16.msra.mxu0 %v1499_v1  ;;  %v695_v1 = vld [vmem:[#allocation7 + $0x18] sm:$0xff] }
  0x9d   : > { %1504 = vmatprep.subr.bf16.mxu0 %v1503_v4  ;;  %v1583_v5 = vpack.c.bf16 %v695_v1, %v694_v0 }
  0xa0   : > { %1506 = vmatpush3.bf16.msra.mxu0 %v1503_v4 }
  0xa1   : > { %1508 = vmatprep.subr.bf16.mxu0 %v1507_v7 }
  0xa4   : > { %1510 = vmatpush3.bf16.msra.mxu0 %v1507_v7 }
  0xa5   : > { %1512 = vmatprep.subr.bf16.mxu0 %v1511_v11 }
  0xa8   : > { %1514 = vmatpush3.bf16.msra.mxu0 %v1511_v11 }
  0xa9   : > { %1516 = vmatprep.subr.bf16.mxu0 %v1515_v14 }
  0xab   : > { %1309 = vmatmul.mubr.f32.vlgmr.msra.gmra.mrb[0].mxu0 %v364_v19  ;;  %v1591_v19 = vpack.c.bf16 %v699_v18, %v698_v17 }
  0xac   : > { %1518 = vmatpush3.bf16.msra.mxu0 %v1515_v14  ;;  %1343 = vmatprep.mubr.f32.mxu0 %v375_v21  ;;  %v701_v21 = vld [vmem:[#allocation7 + $0x48] sm:$0xff] }
  0xad   : > { %1520 = vmatprep.subr.bf16.mxu0 %v1519_v20 }
  0xb0   : > { %1522 = vmatpush3.bf16.msra.mxu0 %v1519_v20  ;;  %v700_v20 = vld [vmem:[#allocation7 + $0x40] sm:$0xff] }
  0xb1   : > { %1524 = vmatprep.subr.bf16.mxu0 %v1523_v24  ;;  %v1595_v22 = vpack.c.bf16 %v701_v21, %v700_v20 }
  0xb4   : > { %1526 = vmatpush3.bf16.msra.mxu0 %v1523_v24  ;;  %v703_v24 = vld [vmem:[#allocation7 + $0x58] sm:$0xff] }
  0xb5   : > { %1528 = vmatprep.subr.bf16.mxu0 %v1527_v27  ;;  %v1599_v37 = vpack.c.bf16 %v703_v24, %v702_v23 }
  0xb8   : > { %1530 = vmatpush3.bf16.msra.mxu0 %v1527_v27  ;;  %v706_v27 = vld [vmem:[#allocation7 + $0x70] sm:$0xff] }
  0xb9   : > { %1532 = vmatprep.subr.bf16.mxu0 %v1531_v30  ;;  %v1607_v29 = vpack.c.bf16 %v707_v28, %v706_v27 }
  0xbc   : > { %1534 = vmatpush3.bf16.msra.mxu0 %v1531_v30  ;;  %v876_v30 = vld [vmem:[#allocation7 + $0x100] sm:$0xff] }
  0xbd   : > { %1536 = vmatprep.subr.bf16.mxu0 %v1535_v33  ;;  %v1611_v32 = vpack.c.bf16 %v877_v31, %v876_v30 }
  0xc0   : > { %1538 = vmatpush3.bf16.msra.mxu0 %v1535_v33  ;;  %v878_v33 = vld [vmem:[#allocation7 + $0x110] sm:$0xff] }
  0xc1   : > { %1540 = vmatprep.subr.bf16.mxu0 %v1539_v36  ;;  %v1615_v35 = vpack.c.bf16 %v879_v34, %v878_v33 }
  0xc4   : > { %1542 = vmatpush3.bf16.msra.mxu0 %v1539_v36  ;;  %v880_v36 = vld [vmem:[#allocation7 + $0x120] sm:$0xff] }
  0xc5   : > { %1544 = vmatprep.subr.bf16.mxu0 %v1543_v41  ;;  %v1619_v39 = vpack.c.bf16 %v881_v38, %v880_v36 }
  0xc8   : > { %1546 = vmatpush3.bf16.msra.mxu0 %v1543_v41  ;;  %v883_v41 = vld [vmem:[#allocation7 + $0x138] sm:$0xff] }
  0xc9   : > { %v1623_v42 = vpack.c.bf16 %v883_v41, %v882_v40 }
  0xcb   : > { %1344 = vmatmul.mubr.msk.f32.vlgmr.msra.gmra.mrb[0].mxu0 %vm2165_vm3, %v376_v44  ;;  %v884_v44 = vld [vmem:[#allocation7 + $0x140] sm:$0xff] }
  0xcc   : > { %v1627_v47 = vpack.c.bf16 %v885_v46, %v884_v44 }
 0x19e   : > { %v1345_v57 = vpop.f32.mrb[0].mxu0 }
 0x19f   : > { %v668_v59 = vmul.f32 %v1345_v57, %v1116_v56  ;;  %v649_v60 = vpop.f32.mrb[1].mxu0 }
 0x1a0   : > { %v667_v61 = vmul.f32 %v1116_v56, %v649_v60  ;;  %v891_v56 = vld [vmem:[#allocation7 + $0x178] sm:$0xff]  ;;  %v1123_v60 = vld [vmem:[%s2258_s6] ss:$0 sm:$0xff] }
 0x1a1   : > { %v677_v62 = vadd.f32 %v1117_v58, %v668_v59 }
 0x1a2   : > { %v676_v63 = vadd.f32 %v1117_v58, %v667_v61  ;;  %v1122_v58 = vld [vmem:[%s2257_s5] ss:$0 sm:$0xff] }
 0x1a3   : > { %v679_v2 = vmax.f32 %v677_v62, 0.0 }
 0x1a4   : > { %v678_v3 = vmax.f32 %v676_v63, 0.0 }
 0x1a5   : > { %v681_v4 = vrot.slane %v679_v2, 7  ;;  %v687_v6 = vrot.slane %v679_v2, 1 }
 0x1a6   : > { %v680_v7 = vrot.slane %v678_v3, 7  ;;  %1378 = vmatprep.mubr.f32.mxu1 %v678_v3  ;;  %v686_v11 = vrot.slane %v678_v3, 1 }
 0x1a7   : > { %1379 = vmatmul.mubr.f32.vlgmr.msra.gmra.mrb[0].mxu1 %v679_v2 }
 0x1a8   : > { %1582 = vmatpush3.bf16.msra.mxu1 %v1579_v54  ;;  %v683_v12 = vsel %vm363_vm0, %v681_v4, %v680_v7  ;;  %v682_v13 = vsel %vm363_vm0, %v680_v7, %v681_v4  ;;  %v688_v14 = vsel %vm374_vm2, %v686_v11, %v687_v6  ;;  %v2185_v15 = vsel %vm374_vm2, %v687_v6, %v686_v11  ;;  %v890_v54 = vld [vmem:[#allocation7 + $0x170] sm:$0xff] }
 0x1a9   : > { %1413 = vmatprep.mubr.msk.f32.mxu1 %vm2144_vm1, %v683_v12  ;;  %1584 = vmatprep.subr.bf16.mxu1 %v1583_v5  ;;  %v1639_v57 = vpack.c.bf16 %v891_v56, %v890_v54 }
 0x1ac   : > { %1586 = vmatpush3.bf16.msra.mxu1 %v1583_v5 }
 0x1ad   : > { %1588 = vmatprep.subr.bf16.mxu1 %v1587_v16 }
 0x1b0   : > { %1590 = vmatpush3.bf16.msra.mxu1 %v1587_v16 }
 0x1b1   : > { %1592 = vmatprep.subr.bf16.mxu1 %v1591_v19 }
 0x1b4   : > { %1594 = vmatpush3.bf16.msra.mxu1 %v1591_v19 }
 0x1b5   : > { %1596 = vmatprep.subr.bf16.mxu1 %v1595_v22 }
 0x1b8   : > { %1598 = vmatpush3.bf16.msra.mxu1 %v1595_v22 }
 0x1b9   : > { %1600 = vmatprep.subr.bf16.mxu1 %v1599_v37 }
 0x1bc   : > { %1602 = vmatpush3.bf16.msra.mxu1 %v1599_v37 }
 0x1bd   : > { %1604 = vmatprep.subr.bf16.mxu1 %v1603_v26 }
 0x1c0   : > { %1606 = vmatpush3.bf16.msra.mxu1 %v1603_v26 }
 0x1c1   : > { %1608 = vmatprep.subr.bf16.mxu1 %v1607_v29 }
 0x1c4   : > { %1610 = vmatpush3.bf16.msra.mxu1 %v1607_v29 }
 0x1c5   : > { %1612 = vmatprep.subr.bf16.mxu1 %v1611_v32 }
 0x1c7   : > { %1414 = vmatmul.mubr.f32.vlgmr.msra.gmra.mrb[0].mxu1 %v682_v13 }
 0x1c8   : > { %1614 = vmatpush3.bf16.msra.mxu1 %v1611_v32  ;;  %1448 = vmatprep.mubr.f32.mxu1 %v688_v14 }
 0x1c9   : > { %1616 = vmatprep.subr.bf16.mxu1 %v1615_v35 }
 0x1cc   : > { %1618 = vmatpush3.bf16.msra.mxu1 %v1615_v35 }
 0x1cd   : > { %1620 = vmatprep.subr.bf16.mxu1 %v1619_v39 }
 0x1d0   : > { %1622 = vmatpush3.bf16.msra.mxu1 %v1619_v39 }
 0x1d1   : > { %1624 = vmatprep.subr.bf16.mxu1 %v1623_v42 }
 0x1d4   : > { %1626 = vmatpush3.bf16.msra.mxu1 %v1623_v42 }
 0x1d5   : > { %1628 = vmatprep.subr.bf16.mxu1 %v1627_v47 }
 0x1d8   : > { %1630 = vmatpush3.bf16.msra.mxu1 %v1627_v47 }
 0x1d9   : > { %1632 = vmatprep.subr.bf16.mxu1 %v1631_v50 }
 0x1dc   : > { %1634 = vmatpush3.bf16.msra.mxu1 %v1631_v50 }
 0x1dd   : > { %1636 = vmatprep.subr.bf16.mxu1 %v1635_v53 }
 0x1e0   : > { %1638 = vmatpush3.bf16.msra.mxu1 %v1635_v53 }
 0x1e1   : > { %1640 = vmatprep.subr.bf16.mxu1 %v1639_v57 }
 0x1e4   : > { %1642 = vmatpush3.bf16.msra.mxu1 %v1639_v57 }
 0x1e7   : > { %1449 = vmatmul.mubr.msk.f32.vlgmr.msra.gmra.mrb[0].mxu1 %vm2165_vm3, %v2185_v15 }
 0x2ba   : > { %v1450_v59 = vpop.f32.mrb[0].mxu1 }
 0x2bb   : > { %v977_v61 = vmul.f32 %v1450_v59, %v1122_v58  ;;  %v958_v62 = vpop.f32.mrb[1].mxu1 }
 0x2bc   : > { %v976_v63 = vmul.f32 %v1122_v58, %v958_v62 }
 0x2bd   : > { %v986_v0 = vadd.f32 %v1123_v60, %v977_v61 }
 0x2be   : > { %v985_v45 = vadd.f32 %v1123_v60, %v976_v63 }
 0x2bf   : > { %v988_v1 = vadd.f32 %v986_v0, %v2132_v43 }
 0x2c0   : > { %v987_v2 = vadd.f32 %v985_v45, %v2126_v9 }
 0x2c1   : > { %v990_v3 = vmax.f32 %v988_v1, 0.0 }
 0x2c2   : > { %v989_v4 = vmax.f32 %v987_v2, 0.0 }
 0x2c3   : > { %992 = vst [vmem:[%s325_s21 + $0x8] sm:$0xff] %v990_v3 }
 0x2c4   : > { %991 = vst [vmem:[%s325_s21] sm:$0xff] %v989_v4 }
 0x2c5   : > { %1821 = shalt.err (!%p1818_p1)
}
 0x2c6   : > { %s1822_s15 = scalar_lea.hbm %s2208_s9, 256  ;;  %s1826_s21 = scalar_lea.hbm %s2259_s7, 512 }
 0x2c7   : > { %p1823_p13 = scmp.ne.s32.totalorder %s2208_s9, %s1822_s15  ;;  %p1827_p4 = scmp.lt.u32.totalorder %s2208_s9, %s2259_s7 }
 0x2c8   : > { %p1828_p5 = scmp.lt.u32.totalorder %s1826_s21, %s1822_s15  ;;  %p1830_p11 = scmp.lt.u32.totalorder %s1822_s15, %s2208_s9 }
 0x2c9   : > { %p1824_p6 = pnand %p1823_p13, %p2279_p0 }
 0x2ca   : > { %p1829_p8 = por %p1828_p5, %p1827_p4 }
 0x2cb   : > { %p1825_p10 = pneg %p1824_p6 }
 0x2cc   : > { %p1831_p2 = por %p1830_p11, %p1829_p8 }
 0x2ce   : > { %p1832_p3 = pnand %p1831_p2, %p1825_p10 }
 0x2d0   : > { %1835 = shalt.err (!%p1832_p3)
}
 0x2d1   : > { %s1886_s30 = smov 128   ;;  %s1887_s28 = smov 8  }
 0x2d2   : > { %1661 = dma.vmem_to_hbm [thread:$0]  (%p2279_p0), %s2202_s23, 256, %s2208_s9, %s994_s22, %s1886_s30, %s1886_s30, %s1887_s28  }
 0x2d3 PF: > { %s1022_s29 = sand.u32 1, %s1866_s24   ;;  %p2280_p7 = scmp.ne.s32.totalorder %s2265_s8, 0 }
 0x2d4   : > { %p2281_p9 = scmp.ge.s32.totalorder %s1878_s27, 2  ;;  %s1023_s11 = scalar_lea.sflag [#allocation4], %s1022_s29 }
 0x2d6   : > { %p1675_p12 = pnand %p2281_p9, %p2280_p7 }
 0x2d8   : > { %1861 = dma.done.wait (!%p1675_p12), %s1023_s11, 256  }
 0x2d9   : > { %1863 = vsyncadd (!%p1675_p12), %s1023_s11, 4294967040  ;;  %p21_p1 = scmp.ge.s32.totalorder %s2044_s12, 4   ;;  %s2282_s24 = smov %s1870_s25 }
 0x2da   : > { %s2283_s25 = smov %s1874_s26  ;;  %s2284_s26 = smov %s2060_s17 }
 0x2db   : > { %s2285_s27 = smov %s2044_s12  ;;  %23 = sbr.rel (!%p21_p1) target bundleno = 6 (0x6), region = 105 }
 0x2e2   :  { %1028 = vsyncpa [#allocation3], 1 }
 0x2e3   :  { %1030 = vsyncpa [#allocation3 + $0x1], 1 }
 0x2e4   :  { %1031 = vsyncpa [#allocation6], 1 }
 0x2e5   :  { %1032 = vsyncpa [#allocation4], 1 }
 0x2e6   :  { %1034 = vsyncpa [#allocation4 + $0x1], 1 }

</bundles_post_ra>
